<compile_context>
chip_gen: v7x
topology: tpu7x:2x2x1
jax: 0.10.0
libtpu: 0.0.40
codegen_flags: <defaults>
</compile_context>

<pallas_src>
import functools
import math

import jax
import jax.numpy as jnp
from jax.experimental import pallas as pl
from jax.experimental.pallas import tpu as pltpu


def _fcn_kernel(use_bf16_tanh):
    act_dtype = jnp.bfloat16 if use_bf16_tanh else jnp.float32

    def kernel(x_ref, w1_ref, b1_ref, w2_ref, b2_ref, w3_ref, b3_ref, o_ref):
        # x_ref:  (2, tm)    batch-on-lanes input tile
        # w1_ref: (32, 2),  b1_ref: (32, 1)
        # w2_ref: (32, 32), b2_ref: (32, 1)
        # w3_ref: (1, 32),  b3_ref: (1, 1)
        # o_ref:  (1, tm)
        x0 = x_ref[0:1, :]                               # (1, tm)
        x1 = x_ref[1:2, :]                               # (1, tm)

        # Layer 1: Linear(2 -> 32) + tanh.  K=2 would waste the MXU, so do it as two
        # VPU FMAs (outer-product broadcasts: (32,1)*(1,tm) -> (32,tm)).
        z1 = w1_ref[:, 0:1] * x0 + w1_ref[:, 1:2] * x1 + b1_ref[...]
        a1 = jnp.tanh(z1.astype(act_dtype))              # (32, tm)  EUP (bf16 on v6e/v7x)

        # Layer 2: Linear(32 -> 32) + tanh on the MXU, f32 accumulation.
        w2 = w2_ref[...].astype(act_dtype)
        z2 = jnp.dot(w2, a1, preferred_element_type=jnp.float32) + b2_ref[...]
        a2 = jnp.tanh(z2.astype(act_dtype))              # (32, tm)

        # Layer 3: Linear(32 -> 1), no activation.
        w3 = w3_ref[...].astype(act_dtype)
        z3 = jnp.dot(w3, a2, preferred_element_type=jnp.float32) + b3_ref[...]
        o_ref[...] = z3.astype(o_ref.dtype)              # (1, tm) lane-dense store

    return kernel


def _choose_tiles(n, tm_max):
    """Lane-tile selection: multiple of 128, sized to N (minimal padded lanes),
    capped at tm_max, and >= 2 balanced tiles whenever possible so the 'parallel'
    batch axis can be sharded across both v7x TensorCores."""
    lane_groups = pl.cdiv(n, 128)                 # number of 128-lane groups needed
    max_groups = max(1, int(tm_max) // 128)       # per-tile cap (rounded down to 128s)
    min_tiles = 2 if lane_groups >= 2 else 1
    n_tiles = max(min_tiles, pl.cdiv(lane_groups, max_groups))
    groups_per_tile = pl.cdiv(lane_groups, n_tiles)
    n_tiles = max(min_tiles, pl.cdiv(lane_groups, groups_per_tile))
    return 128 * groups_per_tile, n_tiles


@functools.partial(jax.jit, static_argnames=("tm_max", "use_bf16_tanh"))
def _fcn_forward_impl(x, w1, b1, w2, b2, w3, b3, *, tm_max, use_bf16_tanh):
    N, fin = x.shape
    h1, h2, fout = w1.shape[0], w2.shape[0], w3.shape[0]
    assert fin == w1.shape[1]

    tm, n_tiles = _choose_tiles(N, tm_max)
    n_pad = n_tiles * tm

    # Feature-major input (2, N_pad), batch on lanes; pad+transpose fuse under jit.
    x_t = jnp.pad(x.astype(jnp.float32), ((0, n_pad - N), (0, 0))).T

    full = lambda shape: pl.BlockSpec(shape, lambda i: (0, 0))

    out_t = pl.pallas_call(
        _fcn_kernel(use_bf16_tanh),
        out_shape=jax.ShapeDtypeStruct((fout, n_pad), jnp.float32),
        grid_spec=pltpu.PrefetchScalarGridSpec(
            num_scalar_prefetch=0,
            grid=(n_tiles,),
            in_specs=[
                pl.BlockSpec((fin, tm), lambda i: (0, i)),   # x tile (2, tm)
                full((h1, fin)),                             # w1 (32, 2)
                full((h1, 1)),                               # b1 (32, 1)
                full((h2, h1)),                              # w2 (32, 32)
                full((h2, 1)),                               # b2 (32, 1)
                full((fout, h2)),                            # w3 (1, 32)
                full((fout, 1)),                             # b3 (1, 1)
            ],
            out_specs=pl.BlockSpec((fout, tm), lambda i: (0, i)),
        ),
        compiler_params=pltpu.CompilerParams(
            dimension_semantics=("parallel",),               # batch axis -> megacore
        ),
    )(x_t, w1, b1, w2, b2, w3, b3)

    # (1, N_pad) -> (N, 1); slicing/transposing a (1, N) slab is cheap and fused.
    return out_t[:, :N].T


def _bf16_tanh_supported():
    """bf16 VPU/EUP path exists on v6e/v7x; keep f32 on v5e (and older/unknown)."""
    try:
        kind = jax.devices()[0].device_kind.lower()
    except Exception:
        return False
    return ("v6" in kind) or ("v7" in kind)


def fcn_forward(x, params, *, tm_max=16384, use_bf16_tanh=None):
    """x: (N, 2) float32. params: PyTorch-layout weights (F_out, F_in), biases (F_out, 1).

    Returns (N, 1) float32, matching FCN.forward.  use_bf16_tanh=None auto-enables the
    bf16 fast path on v6e/v7x only (changes numerics at ~1e-3 level); pass False for
    strict-accuracy runs.
    """
    if use_bf16_tanh is None:
        use_bf16_tanh = _bf16_tanh_supported()
    return _fcn_forward_impl(
        x, params["w1"], params["b1"], params["w2"], params["b2"],
        params["w3"], params["b3"],
        tm_max=int(tm_max), use_bf16_tanh=bool(use_bf16_tanh),
    )


def init_fcn_params(key, layers=(2, 32, 32, 1)):
    """Xavier-normal weights (gain=1.0), zero biases, PyTorch (F_out, F_in) layout."""
    params = {}
    keys = jax.random.split(key, len(layers) - 1)
    for idx in range(len(layers) - 1):
        fan_in, fan_out = layers[idx], layers[idx + 1]
        std = math.sqrt(2.0 / (fan_in + fan_out))  # xavier_normal_, gain=1.0
        params[f"w{idx + 1}"] = std * jax.random.normal(
            keys[idx], (fan_out, fan_in), dtype=jnp.float32
        )
        params[f"b{idx + 1}"] = jnp.zeros((fan_out, 1), dtype=jnp.float32)
    return params


def fcn_reference(x, params):
    """Pure-JAX reference (PyTorch semantics) for correctness check."""
    a = jnp.tanh(x @ params["w1"].T + params["b1"].T)
    a = jnp.tanh(a @ params["w2"].T + params["b2"].T)
    return a @ params["w3"].T + params["b3"].T


if __name__ == "__main__":
    key = jax.random.PRNGKey(0)
    pkey, xkey, xkey2 = jax.random.split(key, 3)

    layers = (2, 32, 32, 1)
    params = init_fcn_params(pkey, layers)

    # Small PINN-style input: N collocation points, 2 coordinates (x, t).
    N = 200  # matches total_points_x in the notebook
    x = jax.random.uniform(xkey, (N, 2), dtype=jnp.float32, minval=-1.0, maxval=1.0)

    # Strict-accuracy f32 path (works on every TPU generation).
    out = jax.block_until_ready(fcn_forward(x, params, use_bf16_tanh=False))
    ref = fcn_reference(x, params)
    assert out.shape == (N, 1), out.shape
    assert jnp.allclose(out, ref, atol=1e-5, rtol=1e-5), "f32 mismatch vs JAX reference"

    # Exercise the multi-group tiling path (N=1000 -> 2 balanced tiles of 512 lanes).
    N2 = 1000
    x2 = jax.random.uniform(xkey2, (N2, 2), dtype=jnp.float32, minval=-1.0, maxval=1.0)
    out2 = jax.block_until_ready(fcn_forward(x2, params, use_bf16_tanh=False))
    ref2 = fcn_reference(x2, params)
    assert out2.shape == (N2, 1), out2.shape
    assert jnp.allclose(out2, ref2, atol=1e-5, rtol=1e-5), "f32 mismatch (N=1000)"

    # bf16-tanh fast path (v6e / v7x only): looser tolerance by design.
    if _bf16_tanh_supported():
        out_bf = jax.block_until_ready(fcn_forward(x, params, use_bf16_tanh=True))
        assert out_bf.shape == (N, 1), out_bf.shape
        assert jnp.allclose(out_bf, ref, atol=5e-2, rtol=5e-2), "bf16 path mismatch"

    print("KERNEL_OK")
</pallas_src>

<mosaic_0001>
module attributes {stable_mosaic.version = 11 : i64} {
  func.func @kernel(%arg0: i32, %arg1: memref<2x128xf32, #tpu.memory_space<vmem>>, %arg2: memref<32x2xf32, #tpu.memory_space<vmem>>, %arg3: memref<32x1xf32, #tpu.memory_space<vmem>>, %arg4: memref<32x32xf32, #tpu.memory_space<vmem>>, %arg5: memref<32x1xf32, #tpu.memory_space<vmem>>, %arg6: memref<1x32xf32, #tpu.memory_space<vmem>>, %arg7: memref<1x1xf32, #tpu.memory_space<vmem>>, %arg8: memref<1x128xf32, #tpu.memory_space<vmem>>) attributes {dimension_semantics = [#tpu.dimension_semantics<parallel>], iteration_bounds = array<i64: 2>, scalar_prefetch = 0 : i64, scratch_operands = 0 : i64, tpu.core_type = #tpu.core_type<tc>, window_params = [{transform_indices = @transform_0, window_bounds = array<i64: 2, 128>}, {pipeline_mode = #tpu.pipeline_mode<synchronous>, transform_indices = @transform_1, window_bounds = array<i64: 32, 2>}, {pipeline_mode = #tpu.pipeline_mode<synchronous>, transform_indices = @transform_2, window_bounds = array<i64: 32, 1>}, {pipeline_mode = #tpu.pipeline_mode<synchronous>, transform_indices = @transform_3, window_bounds = array<i64: 32, 32>}, {pipeline_mode = #tpu.pipeline_mode<synchronous>, transform_indices = @transform_4, window_bounds = array<i64: 32, 1>}, {pipeline_mode = #tpu.pipeline_mode<synchronous>, transform_indices = @transform_5, window_bounds = array<i64: 1, 32>}, {pipeline_mode = #tpu.pipeline_mode<synchronous>, transform_indices = @transform_6, window_bounds = array<i64: 1, 1>}, {transform_indices = @transform_7, window_bounds = array<i64: 1, 128>}]} {
    %c0 = arith.constant 0 : index
    %c0_0 = arith.constant 0 : index
    %0 = vector.load %arg1[%c0, %c0_0] : memref<2x128xf32, #tpu.memory_space<vmem>>, vector<1x128xf32>
    %c1 = arith.constant 1 : index
    %c0_1 = arith.constant 0 : index
    %1 = vector.load %arg1[%c1, %c0_1] : memref<2x128xf32, #tpu.memory_space<vmem>>, vector<1x128xf32>
    %c0_2 = arith.constant 0 : index
    %c0_3 = arith.constant 0 : index
    %2 = vector.load %arg2[%c0_2, %c0_3] : memref<32x2xf32, #tpu.memory_space<vmem>>, vector<32x1xf32>
    %3 = vector.broadcast %2 : vector<32x1xf32> to vector<32x128xf32>
    %4 = vector.broadcast %0 : vector<1x128xf32> to vector<32x128xf32>
    %5 = arith.mulf %3, %4 : vector<32x128xf32>
    %c0_4 = arith.constant 0 : index
    %c1_5 = arith.constant 1 : index
    %6 = vector.load %arg2[%c0_4, %c1_5] : memref<32x2xf32, #tpu.memory_space<vmem>>, vector<32x1xf32>
    %7 = vector.broadcast %6 : vector<32x1xf32> to vector<32x128xf32>
    %8 = vector.broadcast %1 : vector<1x128xf32> to vector<32x128xf32>
    %9 = arith.mulf %7, %8 : vector<32x128xf32>
    %10 = arith.addf %5, %9 : vector<32x128xf32>
    %c0_6 = arith.constant 0 : index
    %c0_7 = arith.constant 0 : index
    %11 = vector.load %arg3[%c0_6, %c0_7] : memref<32x1xf32, #tpu.memory_space<vmem>>, vector<32x1xf32>
    %12 = vector.broadcast %11 : vector<32x1xf32> to vector<32x128xf32>
    %13 = arith.addf %10, %12 : vector<32x128xf32>
    %14 = math.tanh %13 : vector<32x128xf32>
    %c0_8 = arith.constant 0 : index
    %c0_9 = arith.constant 0 : index
    %15 = vector.load %arg4[%c0_8, %c0_9] : memref<32x32xf32, #tpu.memory_space<vmem>>, vector<32x32xf32>
    %cst = arith.constant dense<0.000000e+00> : vector<32x128xf32>
    %16 = tpu.matmul %15, %14, %cst {dimension_numbers = #tpu.dot_dimension_numbers<[1], [0], [0], [1], [0, 0, 1, 1], [], []>} : vector<32x32xf32>, vector<32x128xf32>, vector<32x128xf32> -> vector<32x128xf32>
    %c0_10 = arith.constant 0 : index
    %c0_11 = arith.constant 0 : index
    %17 = vector.load %arg5[%c0_10, %c0_11] : memref<32x1xf32, #tpu.memory_space<vmem>>, vector<32x1xf32>
    %18 = vector.broadcast %17 : vector<32x1xf32> to vector<32x128xf32>
    %19 = arith.addf %16, %18 : vector<32x128xf32>
    %20 = math.tanh %19 : vector<32x128xf32>
    %c0_12 = arith.constant 0 : index
    %c0_13 = arith.constant 0 : index
    %21 = vector.load %arg6[%c0_12, %c0_13] : memref<1x32xf32, #tpu.memory_space<vmem>>, vector<1x32xf32>
    %cst_14 = arith.constant dense<0.000000e+00> : vector<1x128xf32>
    %22 = tpu.matmul %21, %20, %cst_14 {dimension_numbers = #tpu.dot_dimension_numbers<[1], [0], [0], [1], [0, 0, 1, 1], [], []>} : vector<1x32xf32>, vector<32x128xf32>, vector<1x128xf32> -> vector<1x128xf32>
    %c0_15 = arith.constant 0 : index
    %c0_16 = arith.constant 0 : index
    %23 = vector.load %arg7[%c0_15, %c0_16] : memref<1x1xf32, #tpu.memory_space<vmem>>, vector<1x1xf32>
    %24 = vector.broadcast %23 : vector<1x1xf32> to vector<1x128xf32>
    %25 = arith.addf %22, %24 : vector<1x128xf32>
    %c0_17 = arith.constant 0 : index
    %c0_18 = arith.constant 0 : index
    %26 = vector.load %arg8[%c0_17, %c0_18] : memref<1x128xf32, #tpu.memory_space<vmem>>, vector<1x128xf32>
    tpu.vector_store %arg8[%c0_17, %c0_18], %25 {strides = array<i32>} : memref<1x128xf32, #tpu.memory_space<vmem>>, vector<1x128xf32>,
    return
  }
  func.func @transform_0(%arg0: i32) -> (i32, i32) {
    %c0_i32 = arith.constant 0 : i32
    %c0_i32_0 = arith.constant 0 : i32
    return %c0_i32, %arg0 : i32, i32
  }
  func.func @transform_1(%arg0: i32) -> (i32, i32) {
    %c0_i32 = arith.constant 0 : i32
    %c0_i32_0 = arith.constant 0 : i32
    %c0_i32_1 = arith.constant 0 : i32
    return %c0_i32, %c0_i32_0 : i32, i32
  }
  func.func @transform_2(%arg0: i32) -> (i32, i32) {
    %c0_i32 = arith.constant 0 : i32
    %c0_i32_0 = arith.constant 0 : i32
    %c0_i32_1 = arith.constant 0 : i32
    return %c0_i32, %c0_i32_0 : i32, i32
  }
  func.func @transform_3(%arg0: i32) -> (i32, i32) {
    %c0_i32 = arith.constant 0 : i32
    %c0_i32_0 = arith.constant 0 : i32
    %c0_i32_1 = arith.constant 0 : i32
    return %c0_i32, %c0_i32_0 : i32, i32
  }
  func.func @transform_4(%arg0: i32) -> (i32, i32) {
    %c0_i32 = arith.constant 0 : i32
    %c0_i32_0 = arith.constant 0 : i32
    %c0_i32_1 = arith.constant 0 : i32
    return %c0_i32, %c0_i32_0 : i32, i32
  }
  func.func @transform_5(%arg0: i32) -> (i32, i32) {
    %c0_i32 = arith.constant 0 : i32
    %c0_i32_0 = arith.constant 0 : i32
    %c0_i32_1 = arith.constant 0 : i32
    return %c0_i32, %c0_i32_0 : i32, i32
  }
  func.func @transform_6(%arg0: i32) -> (i32, i32) {
    %c0_i32 = arith.constant 0 : i32
    %c0_i32_0 = arith.constant 0 : i32
    %c0_i32_1 = arith.constant 0 : i32
    return %c0_i32, %c0_i32_0 : i32, i32
  }
  func.func @transform_7(%arg0: i32) -> (i32, i32) {
    %c0_i32 = arith.constant 0 : i32
    %c0_i32_0 = arith.constant 0 : i32
    return %c0_i32, %arg0 : i32, i32
  }
}

</mosaic_0001>

<bundles_post_ra>
// kernel: _fcn_forward_impl.1
= control target key start
LH: loop header
LB: loop body
LE: loop exit
PB: predicated region body
PF: predicated region fallthrough
CT: control target
= control target key end

     0   :  { %s788_s26 = smov 0   ;;  %s869_s0 = inlined_call_operand.vmem [shape: f32[2,256], index: 0, kind: input, shape index: {}]   ;;  %s870_s1 = inlined_call_operand.vmem [shape: f32[32,2], index: 1, kind: input, shape index: {}]   ;;  %s871_s2 = inlined_call_operand.vmem [shape: f32[32,1], index: 2, kind: input, shape index: {}]   ;;  %s872_s3 = inlined_call_operand.vmem [shape: f32[32,32], index: 3, kind: input, shape index: {}]   ;;  %s873_s4 = inlined_call_operand.vmem [shape: f32[32,1], index: 4, kind: input, shape index: {}]   ;;  %s874_s5 = inlined_call_operand.vmem [shape: f32[1,32], index: 5, kind: input, shape index: {}]   ;;  %s875_s6 = inlined_call_operand.<no memory space> [shape: f32[1,1], index: 6, kind: input, shape index: {}]   ;;  %s876_s7 = inlined_call_operand.vmem [shape: f32[1,256], index: 7, kind: output, shape index: {}]  }
   0x1   :  { %v12_v0 = vstv %s875_s6 }
   0x2   :  { %13 = vst [vmem:[#allocation2] sm:$0x1] %v12_v0 }
   0x3 LB: > { %s630_s27 = sadd.s32 4294967295, %s738_s26   ;;  %p634_p0 = scmp.ge.s32.totalorder %s738_s26, 1  ;;  %s738_s26 = sphi %s788_s26, %s19_s26  }
   0x4   : > { %p238_p1 = scmp.lt.s32.totalorder %s738_s26, 3 }
   0x6   : > { %p239_p2 = pnand %p634_p0, %p238_p1 }
   0x7   : > { %v278_v1 = vld [vmem:[%s870_s1 + $0x10] sm:$0xff] (!%p239_p2)  ;;  %v276_v2 = vld [vmem:[%s870_s1] sm:$0xff] (!%p239_p2)  ;;  %v740_v3 = vmov (!%p239_p2), 1   ;;  %v277_v4 = vld [vmem:[%s870_s1 + $0x8] sm:$0xff] (!%p239_p2)  ;;  %v741_v5 = vmov (!%p239_p2), 0   ;;  %vm396_vm0 = vcmask (!%p239_p2), 261120  }
   0x8   : > { %242 = sbr.rel (%p239_p2) target bundleno = 633 (0x279), region = 48  ;;  %712 = vset.pattern.permute.xlu0 (!%p239_p2), %v740_v3  ;;  %710 = vset.pattern.permute.xlu1 (!%p239_p2), %v740_v3  ;;  %v279_v6 = vld [vmem:[%s870_s1 + $0x18] sm:$0xff] (!%p239_p2)  ;;  %v337_v7 = vld [vmem:[%s871_s2 + $0x8] sm:$0xff] (!%p239_p2)  ;;  %v336_v8 = vld [vmem:[%s871_s2] sm:$0xff] (!%p239_p2)  ;;  %p267_p3 = scmp.lt.s32.totalorder (!%p239_p2), %s630_s27, 1  ;;  %v742_v56 = vmov (!%p239_p2), 0.0|0.0  }
   0x9   : > { %317 = vperm.xlu0 (!%p239_p2), %712, %v278_v1   ;;  %309 = vperm.xlu1 (!%p239_p2), %710, %v276_v2   ;;  %v372_v9 = vld [vmem:[%s873_s4] sm:$0xff] (!%p239_p2)  ;;  %v338_v10 = vld [vmem:[%s871_s2 + $0x10] sm:$0xff] (!%p239_p2)  ;;  %v339_v12 = vld [vmem:[%s871_s2 + $0x18] sm:$0xff] (!%p239_p2)  ;;  %vm743_vm1 = vmmov (!%p239_p2), 0   ;;  %v744_v57 = vmov (!%p239_p2), 0.0  }
   0xa   : > { %v374_v11 = vld [vmem:[%s873_s4 + $0x10] sm:$0xff] (!%p239_p2)  ;;  %v499_v13 = vld [vmem:[#allocation2] sm:$0x1] (!%p239_p2)  ;;  %v373_v14 = vld [vmem:[%s873_s4 + $0x8] sm:$0xff] (!%p239_p2)  ;;  %691 = vmatprep.subr.bf16.mxu1 (!%p239_p2), %v742_v56  ;;  %680 = vmatprep.mubr.msk.f32.mxu1 (!%p239_p2), %vm743_vm1, %v744_v57 }
   0xb   : > { %v375_v15 = vld [vmem:[%s873_s4 + $0x18] sm:$0xff] (!%p239_p2)  ;;  %v368_v16 = vld [vmem:[%s872_s3] sm:$0xff] (!%p239_p2)  ;;  %v369_v53 = vld [vmem:[%s872_s3 + $0x8] sm:$0xff] (!%p239_p2) }
   0xc   : > { %666 = vmatprep.mubr.msk.f32.mxu0 (!%p239_p2), %vm396_vm0, %v368_v16  ;;  %v370_v54 = vld [vmem:[%s872_s3 + $0x10] sm:$0xff] (!%p239_p2)  ;;  %v371_v55 = vld [vmem:[%s872_s3 + $0x18] sm:$0xff] (!%p239_p2) }
   0xd   : > { %713 = vset.pattern.permute.xlu0 (!%p239_p2), %v741_v5  ;;  %313 = vperm.xlu1 (!%p239_p2), %710, %v277_v4  }
   0xe   : > { %282 = vperm.xlu0 (!%p239_p2), %713, %v276_v2  }
   0xf   : > { %s878_s27 = smov (!%p267_p3, %s630_s27), 1 }
  0x10   : > { %s635_s8 = sshll.u32 %s878_s27, 1  ;;  %s273_s22 = scalar_lea.vmem %s876_s7, %s878_s27 }
  0x11   : > { %711 = vset.pattern.permute.xlu1 %v741_v5  ;;  %s270_s11 = scalar_lea.vmem %s869_s0, %s635_s8 }
  0x12   : > { %287 = vperm.xlu0 %713, %v277_v4   ;;  %297 = vperm.xlu1 %711, %v279_v6   ;;  %v636_v23 = vld [vmem:[%s270_s11] ss:$0 sm:$0xff]  ;;  %v637_v25 = vld [vmem:[%s270_s11 + $0x1] ss:$0 sm:$0xff] }
  0x16   : > { %292 = vperm.xlu0 %713, %v278_v1   ;;  %714 = vset.pattern.permute.xlu1 %v740_v3 }
  0x17   : > { %321 = vperm.xlu1 %714, %v279_v6  }
  0x1a   : > { %347 = vperm.xlu0 %713, %v337_v7  }
  0x1b   : > { %715 = vset.pattern.permute.xlu1 %v741_v5 }
  0x1c   : > { %342 = vperm.xlu1 %715, %v336_v8  }
  0x1e   : > { %378 = vperm.xlu0 %713, %v372_v9  }
  0x20   : > { %352 = vperm.xlu1 %715, %v338_v10  }
  0x22   : > { %388 = vperm.xlu0 %713, %v374_v11  }
  0x24   : > { %357 = vperm.xlu1 %715, %v339_v12   ;;  %v498_v12 = vld [vmem:[%s874_s5] sm:$0x1] }
  0x26   : > { %502 = vperm.xlu0 %713, %v499_v13   ;;  %v505_v13 = vlaneseq }
  0x28   : > { %383 = vperm.xlu1 %715, %v373_v14   ;;  %v506_v14 = vshrl.u32 %v505_v13, 7 }
  0x2c   : > { %393 = vperm.xlu1 %715, %v375_v15   ;;  %v507_v15 = vsub.s32 0, %v506_v14 }
  0x88   : > { %v310_v17 = vpop.permute.xlu1 %309  ;;  %v318_v18 = vpop.permute.xlu0 %317 }
  0x89   : > { %v328_v30 = vmul.f32 %v637_v25, %v310_v17  ;;  %v330_v38 = vmul.f32 %v637_v25, %v318_v18 }
  0x8c   : > { %v314_v19 = vpop.permute.xlu1 %313 }
  0x8d   : > { %v283_v20 = vpop.permute.xlu0 %282  ;;  %v329_v27 = vmul.f32 %v637_v25, %v314_v19 }
  0x8e   : > { %v304_v28 = vmul.f32 %v636_v23, %v283_v20 }
  0x90   : > { %v332_v34 = vadd.f32 %v328_v30, %v304_v28 }
  0x91   : > { %v288_v21 = vpop.permute.xlu0 %287  ;;  %v298_v22 = vpop.permute.xlu1 %297 }
  0x92   : > { %v305_v24 = vmul.f32 %v636_v23, %v288_v21  ;;  %v307_v42 = vmul.f32 %v636_v23, %v298_v22 }
  0x94   : > { %v333_v31 = vadd.f32 %v329_v27, %v305_v24 }
  0x95   : > { %v293_v26 = vpop.permute.xlu0 %292 }
  0x96   : > { %v322_v29 = vpop.permute.xlu1 %321  ;;  %v306_v35 = vmul.f32 %v636_v23, %v293_v26 }
  0x97   : > { %v331_v39 = vmul.f32 %v637_v25, %v322_v29 }
  0x98   : > { %v334_v41 = vadd.f32 %v330_v38, %v306_v35 }
  0x99   : > { %v348_v32 = vpop.permute.xlu0 %347  ;;  %v335_v44 = vadd.f32 %v331_v39, %v307_v42 }
  0x9a   : > { %v361_v33 = vadd.f32 %v348_v32, %v333_v31 }
  0x9b   : > { %v343_v36 = vpop.permute.xlu1 %342 }
  0x9c   : > { %v360_v37 = vadd.f32 %v343_v36, %v332_v34  ;;  %716 = vtanh.f32 %v361_v33 }
  0x9d   : > { %v379_v59 = vpop.permute.xlu0 %378 }
  0x9e   : > { %718 = vtanh.f32 %v360_v37 }
  0x9f   : > { %v353_v40 = vpop.permute.xlu1 %352 }
  0xa0   : > { %v362_v43 = vadd.f32 %v353_v40, %v334_v41 }
  0xa1   : > { %v389_v2 = vpop.permute.xlu0 %388 }
  0xa2   : > { %720 = vtanh.f32 %v362_v43 }
  0xa3   : > { %v358_v45 = vpop.permute.xlu1 %357 }
  0xa4   : > { %v363_v46 = vadd.f32 %v358_v45, %v335_v44 }
  0xa5   : > { %v503_v16 = vpop.permute.xlu0 %502 }
  0xa6   : > { %722 = vtanh.f32 %v363_v46  ;;  %v717_v47 = vpop.eup %716  ;;  %v508_v17 = vrot.slane %v503_v16, %v507_v15 }
  0xa7   : > { %v384_v58 = vpop.permute.xlu1 %383 }
  0xa8   : > { %v719_v48 = vpop.eup %718 }
  0xa9   : > { %v683_v49 = vpack.c.bf16 %v717_v47, %v719_v48 }
  0xab   : > { %684 = vmatprep.subr.bf16.mxu0 %v683_v49  ;;  %v394_v0 = vpop.permute.xlu1 %393 }
  0xac   : > { %686 = vmatpush3.bf16.msra.mxu0 %v683_v49  ;;  %v721_v50 = vpop.eup %720 }
  0xb0   : > { %v723_v51 = vpop.eup %722 }
  0xb1   : > { %v687_v52 = vpack.c.bf16 %v723_v51, %v721_v50 }
  0xb3   : > { %688 = vmatprep.subr.bf16.mxu0 %v687_v52 }
  0xb4   : > { %690 = vmatpush3.bf16.msra.mxu0 %v687_v52 }
  0xb7   : > { %667 = vmatmul.mubr.msk.f32.vlgmr.msra.gmra.mrb[0].mxu0 %vm396_vm0, %v369_v53 }
  0xb8   : > { %669 = vmatprep.mubr.msk.f32.mxu0 %vm396_vm0, %v370_v54 }
  0xbb   : > { %670 = vmatmul.mubr.msk.f32.gmra.mrb[2].mxu0 %vm396_vm0, %v371_v55 }
 0x18a   : > { %v668_v60 = vpop.f32.mrb[0].mxu0 }
 0x18b   : > { %v481_v61 = vadd.f32 %v668_v60, %v384_v58  ;;  %v475_v62 = vpop.f32.mrb[1].mxu0 }
 0x18c   : > { %v476_v63 = vadd.f32 %v475_v62, %v379_v59 }
 0x18d   : > { %724 = vtanh.f32 %v481_v61 }
 0x18e   : > { %726 = vtanh.f32 %v476_v63  ;;  %v671_v1 = vpop.f32.mrb[2].mxu0 }
 0x18f   : > { %v491_v3 = vadd.f32 %v671_v1, %v394_v0  ;;  %v485_v4 = vpop.f32.mrb[3].mxu0 }
 0x190   : > { %v486_v5 = vadd.f32 %v485_v4, %v389_v2 }
 0x191   : > { %728 = vtanh.f32 %v491_v3 }
 0x192   : > { %730 = vtanh.f32 %v486_v5 }
 0x197   : > { %v725_v6 = vpop.eup %724 }
 0x198   : > { %v727_v7 = vpop.eup %726 }
 0x199   : > { %v692_v8 = vpack.c.bf16 %v725_v6, %v727_v7 }
 0x19b   : > { %v729_v9 = vpop.eup %728  ;;  %693 = vmatpush3.bf16.msra.mxu1 %v692_v8 }
 0x19c   : > { %v731_v10 = vpop.eup %730  ;;  %694 = vmatprep.subr.bf16.mxu1 %v742_v56 }
 0x19d   : > { %v695_v11 = vpack.c.bf16 %v729_v9, %v731_v10 }
 0x19f   : > { %696 = vmatpush3.bf16.msra.mxu1 %v695_v11 }
 0x1a2   : > { %681 = vmatmul.mubr.msk.f32.vlgmr.msra.gmra.mrb[0].mxu1 %vm396_vm0, %v498_v12 }
 0x275   : > { %v578_v18 = vpop.f32.mrb[0].mxu1 }
 0x276   : > { %v579_v19 = vadd.f32 %v578_v18, %v508_v17  ;;  %v682_v20 = vpop.f32.mrb[1].mxu1 }
 0x278   : > { %582 = vst [vmem:[%s273_s22] sm:$0x1] %v579_v19 }
 0x279 PF: > { %s19_s26 = sadd.s32 1, %s738_s26  }
 0x27a   : > { %p16_p4 = scmp.ge.s32.totalorder %s19_s26, 4  }
 0x27c   :  { %18 = sbr.rel (!%p16_p4) target bundleno = 3 (0x3), region = 78 }

</bundles_post_ra>
